<compile_context>
chip_gen: v7x
topology: tpu7x:2x2x1
jax: 0.10.0
libtpu: 0.0.40
codegen_flags: <defaults>
</compile_context>

<pallas_src>
import functools

import jax
import jax.numpy as jnp
from jax.experimental import pallas as pl
from jax.experimental.pallas import tpu as pltpu

_LANES = 128
_SUBLANES = 8
_TILE_BYTES = 2 * 1024 * 1024       # streamed buffer target, in the input's native dtype
_MAX_PLANE_BYTES = 4 * 1024 * 1024  # f32 bytes of one (M, N) inner plane of the big pair
_MAX_SMALL_BYTES = 512 * 1024       # native bytes per resident small array
_ACC_BYTES = 512 * 1024             # f32 accumulator budget (bounds acc_g)


def _to3d(a):
    """Merge leading dims -> (G, M, N).  Leading-dim merges are layout preserving."""
    if a.ndim >= 3:
        return a.reshape((-1,) + a.shape[-2:])
    if a.ndim == 2:
        return a.reshape((1,) + a.shape)
    return a.reshape((1, 1, max(1, int(a.size))))


def _atleast2d(a):
    if a.ndim >= 2:
        return a
    return a.reshape((1, max(1, int(a.size))))


def _num_tensorcores():
    """Best-effort TensorCore count; defaults to 1 (no core-split) if unknown."""
    try:
        info = pltpu.get_tpu_info()
        for name in ("num_cores", "core_count", "num_tensorcores", "tensor_core_count"):
            v = getattr(info, name, None)
            if v is not None and int(v) > 0:
                return int(v)
    except Exception:
        pass
    return 1


def _mse_kernel(*refs, n_small, inv_big, inv_small, acc_g, split, n_full, has_invalid):
    """Grid = (core_split, tiles_per_core) if split else (n_full,).

    refs = (big_pred, big_true, [small_pred, small_true] * n_small,
            out_ref, acc_ref(VMEM (ncore, acc_g, M, N) f32))
    """
    big_p, big_t = refs[0], refs[1]
    small_refs = refs[2:2 + 2 * n_small]
    out_ref = refs[2 + 2 * n_small]
    acc_ref = refs[3 + 2 * n_small]

    tile_g, m, n = big_p.shape

    if split:
        i = pl.program_id(0)               # core-split axis ("parallel")
        j = pl.program_id(1)               # streaming reduction axis ("arbitrary")
        nj = pl.num_programs(1)
        block_idx = i * nj + j
    else:
        i = 0
        j = pl.program_id(0)
        nj = pl.num_programs(0)
        block_idx = j

    @pl.when(j == 0)
    def _init():
        # Only this core's slice is touched -> safe whether scratch is shared or per-core.
        acc_ref[i] = jnp.zeros((acc_g, m, n), jnp.float32)

    def _accumulate():
        # Widen to f32 in-register, square, and fold the (tile_g, M, N) squared diffs
        # into the (acc_g, M, N) accumulator with elementwise VPU adds (no per-tile
        # cross-lane reduction; chain depth tile_g // acc_g).
        d = big_p[...].astype(jnp.float32) - big_t[...].astype(jnp.float32)
        sq = d * d
        if tile_g > acc_g:
            folded = sq.reshape(tile_g // acc_g, acc_g, m, n).sum(axis=0)
        else:
            folded = sq
        acc_ref[i] = acc_ref[i] + folded

    if has_invalid:
        # Core-split rounding may give one core a duplicate (clamped) tile: skip it.
        pl.when(block_idx < n_full)(_accumulate)
    else:
        _accumulate()

    @pl.when(j == nj - 1)
    def _finalize():
        part = jnp.sum(acc_ref[i]) * jnp.float32(inv_big)
        if n_small:
            extra = jnp.float32(0.0)
            for s in range(n_small):
                sp = small_refs[2 * s][...].astype(jnp.float32)
                st = small_refs[2 * s + 1][...].astype(jnp.float32)
                dd = sp - st
                extra = extra + jnp.sum(dd * dd) * jnp.float32(inv_small[s])
            if split:
                extra = jnp.where(i == 0, extra, jnp.float32(0.0))  # count smalls once
            part = part + extra
        out_ref[...] = jnp.full(out_ref.shape, part, jnp.float32)


def train_loss(masked_pred_epsX, masked_pred_epsE, pred_y,
               true_epsX, true_epsE, true_y, log=False, *, tile_bytes=_TILE_BYTES):
    """Returns scalar mse = node_MSE + edge_MSE + y_MSE."""
    del log  # TODO(synk): wandb logging has no kernel equivalent.

    pairs = [(masked_pred_epsX, true_epsX),
             (masked_pred_epsE, true_epsE),
             (pred_y, true_y)]
    live = []
    for p, t in pairs:
        assert p.shape == t.shape, (p.shape, t.shape)   # pred/true empty together
        if t.size > 0:
            live.append((p, t, int(t.size)))
    if not live:
        return jnp.float32(0.0)

    live.sort(key=lambda x: x[2], reverse=True)

    extra_terms = jnp.float32(0.0)
    big = None
    smalls = []
    for p, t, n in live:
        if big is None:
            p3, t3 = _to3d(p), _to3d(t)
            if p3.shape[-2] * p3.shape[-1] * 4 <= _MAX_PLANE_BYTES:
                big = (p3, t3, n)
                continue
            # TODO(synk): pathological inner-plane size; computed outside the kernel.
        else:
            nbytes = n * max(jnp.dtype(p.dtype).itemsize, jnp.dtype(t.dtype).itemsize)
            if nbytes <= _MAX_SMALL_BYTES:
                smalls.append((p, t, n))
                continue
            # TODO(synk): oversized secondary pair; computed outside the kernel.
        d = p.astype(jnp.float32) - t.astype(jnp.float32)
        extra_terms = extra_terms + jnp.sum(d * d) / n
    if big is None:
        return extra_terms

    big_p3, big_t3, n_big = big
    g_total, m_dim, n_dim = big_p3.shape
    plane = m_dim * n_dim
    itemsize = max(jnp.dtype(big_p3.dtype).itemsize, jnp.dtype(big_t3.dtype).itemsize)

    # --- byte-based streamed tile (native dtype) --------------------------
    tile_g = max(1, min(g_total, int(tile_bytes) // (plane * itemsize)))
    if tile_g >= 64:
        tile_g -= tile_g % 32           # keep a 32-way fold available
    n_full = g_total // tile_g
    rem = g_total - n_full * tile_g

    # Resident small pairs: native shapes, no pad/reshape.
    small_arrays, inv_small = [], []
    for p, t, n in smalls:
        small_arrays += [_atleast2d(p), _atleast2d(t)]
        inv_small.append(1.0 / n)
    if rem:
        # Ragged tail of the streamed pair (< one tile): folded like a small pair.
        small_arrays += [big_p3[n_full * tile_g:], big_t3[n_full * tile_g:]]
        inv_small.append(1.0 / n_big)
    n_small = len(inv_small)

    # Accumulator depth: largest power of two dividing tile_g, bounded by 32 and bytes.
    acc_cap = max(1, _ACC_BYTES // (plane * 4))
    acc_g = 1
    while acc_g * 2 <= 32 and acc_g * 2 <= acc_cap and tile_g % (acc_g * 2) == 0:
        acc_g *= 2

    # Core split: only on multi-TensorCore chips and only with enough full tiles.
    split = (_num_tensorcores() >= 2) and (n_full >= 8)
    ncore_split = 2 if split else 1
    tiles_per_core = -(-n_full // ncore_split)
    has_invalid = ncore_split * tiles_per_core > n_full

    if split:
        grid = (ncore_split, tiles_per_core)
        dimsem = ("parallel", "arbitrary")
        big_map = lambda i, j: (jnp.minimum(i * tiles_per_core + j, n_full - 1), 0, 0)
        out_map = lambda i, j: (i, 0, 0)

        def _zero_map(rank):
            return lambda i, j, _r=rank: (0,) * _r
    else:
        grid = (n_full,)
        dimsem = ("arbitrary",)
        big_map = lambda j: (j, 0, 0)
        out_map = lambda j: (0, 0, 0)

        def _zero_map(rank):
            return lambda j, _r=rank: (0,) * _r

    in_specs = [pl.BlockSpec((tile_g, m_dim, n_dim), big_map),
                pl.BlockSpec((tile_g, m_dim, n_dim), big_map)]
    for a in small_arrays:
        in_specs.append(pl.BlockSpec(a.shape, _zero_map(a.ndim)))

    kernel = functools.partial(
        _mse_kernel,
        n_small=n_small,
        inv_big=1.0 / n_big,
        inv_small=tuple(inv_small),
        acc_g=acc_g,
        split=split,
        n_full=n_full,
        has_invalid=has_invalid,
    )

    out = pl.pallas_call(
        kernel,
        out_shape=jax.ShapeDtypeStruct((ncore_split, _SUBLANES, _LANES), jnp.float32),
        grid_spec=pltpu.PrefetchScalarGridSpec(
            num_scalar_prefetch=0,
            grid=grid,
            in_specs=in_specs,
            out_specs=pl.BlockSpec((1, _SUBLANES, _LANES), out_map),
            scratch_shapes=[pltpu.VMEM((ncore_split, acc_g, m_dim, n_dim), jnp.float32)],
        ),
        compiler_params=pltpu.CompilerParams(
            dimension_semantics=dimsem,
            vmem_limit_bytes=32 * 1024 * 1024),
    )(big_p3, big_t3, *small_arrays)

    return jnp.sum(out[:, 0, 0]) + extra_terms


def _reference(px, pe, py, tx, te, ty):
    def mse(a, b):
        if b.size == 0:
            return jnp.float32(0.0)
        a32, b32 = a.astype(jnp.float32), b.astype(jnp.float32)
        return jnp.mean((a32 - b32) ** 2)
    return mse(px, tx) + mse(pe, te) + mse(py, ty)


def _make_inputs(key, bs, n, dx, de, dy, dtype):
    k = jax.random.split(key, 6)
    px = jax.random.normal(k[0], (bs, n, dx), jnp.float32).astype(dtype)
    pe = jax.random.normal(k[1], (bs, n, n, de), jnp.float32).astype(dtype)
    py = jax.random.normal(k[2], (bs, dy), jnp.float32).astype(dtype)
    tx = jax.random.normal(k[3], (bs, n, dx), jnp.float32).astype(dtype)
    te = jax.random.normal(k[4], (bs, n, n, de), jnp.float32).astype(dtype)
    ty = jax.random.normal(k[5], (bs, dy), jnp.float32).astype(dtype)
    return px, pe, py, tx, te, ty


if __name__ == "__main__":
    key = jax.random.PRNGKey(0)
    keys = jax.random.split(key, 3)

    # 1) Small DiGress-style shapes: X (2,8,4), E (2,8,8,5), y (2,3); single tile.
    loss_fn = jax.jit(train_loss)
    px, pe, py, tx, te, ty = _make_inputs(keys[0], 2, 8, 4, 5, 3, jnp.float32)
    got = jax.block_until_ready(loss_fn(px, pe, py, tx, te, ty))
    ref = _reference(px, pe, py, tx, te, ty)
    assert jnp.allclose(got, ref, rtol=1e-5, atol=1e-6), (got, ref)

    # 2) bf16 inputs with a small forced tile -> multi-tile streaming + ragged-tail path.
    loss_small_tile = jax.jit(functools.partial(train_loss, tile_bytes=64 * 1024))
    px, pe, py, tx, te, ty = _make_inputs(keys[1], 2, 48, 8, 64, 4, jnp.bfloat16)
    got = jax.block_until_ready(loss_small_tile(px, pe, py, tx, te, ty))
    ref = _reference(px, pe, py, tx, te, ty)
    assert jnp.allclose(got, ref, rtol=1e-4, atol=1e-5), (got, ref)

    # 3) Empty y pair (contributes 0.0) + larger f32 E on the default tile size.
    px, pe, _, tx, te, _ = _make_inputs(keys[2], 4, 32, 8, 16, 4, jnp.float32)
    py = jnp.zeros((4, 0), jnp.float32)
    ty = jnp.zeros((4, 0), jnp.float32)
    got = jax.block_until_ready(loss_fn(px, pe, py, tx, te, ty))
    ref = _reference(px, pe, py, tx, te, ty)
    assert jnp.allclose(got, ref, rtol=1e-5, atol=1e-6), (got, ref)

    print("KERNEL_OK")
</pallas_src>

<mosaic_0001>
module attributes {stable_mosaic.version = 11 : i64} {
  func.func @_mse_kernel(%arg0: i32, %arg1: memref<16x8x5xf32, #tpu.memory_space<vmem>>, %arg2: memref<16x8x5xf32, #tpu.memory_space<vmem>>, %arg3: memref<2x8x4xf32, #tpu.memory_space<vmem>>, %arg4: memref<2x8x4xf32, #tpu.memory_space<vmem>>, %arg5: memref<2x3xf32, #tpu.memory_space<vmem>>, %arg6: memref<2x3xf32, #tpu.memory_space<vmem>>, %arg7: memref<1x8x128xf32, #tpu.memory_space<vmem>>, %arg8: memref<1x16x8x5xf32, #tpu.memory_space<vmem>>) attributes {dimension_semantics = [#tpu.dimension_semantics<arbitrary>], iteration_bounds = array<i64: 1>, scalar_prefetch = 0 : i64, scratch_operands = 1 : i64, tpu.core_type = #tpu.core_type<tc>, window_params = [{transform_indices = @transform_0, window_bounds = array<i64: 16, 8, 5>}, {transform_indices = @transform_1, window_bounds = array<i64: 16, 8, 5>}, {pipeline_mode = #tpu.pipeline_mode<synchronous>, transform_indices = @transform_2, window_bounds = array<i64: 2, 8, 4>}, {pipeline_mode = #tpu.pipeline_mode<synchronous>, transform_indices = @transform_3, window_bounds = array<i64: 2, 8, 4>}, {pipeline_mode = #tpu.pipeline_mode<synchronous>, transform_indices = @transform_4, window_bounds = array<i64: 2, 3>}, {pipeline_mode = #tpu.pipeline_mode<synchronous>, transform_indices = @transform_5, window_bounds = array<i64: 2, 3>}, {pipeline_mode = #tpu.pipeline_mode<synchronous>, transform_indices = @transform_6, window_bounds = array<i64: 1, 8, 128>}]} {
    %c0_i32 = arith.constant 0 : i32
    %0 = arith.cmpi eq, %arg0, %c0_i32 : i32
    %1 = arith.extui %0 : i1 to i32
    %c0_i32_0 = arith.constant 0 : i32
    %2 = arith.cmpi ne, %1, %c0_i32_0 : i32
    scf.if %2 {
      %cst = arith.constant 0.000000e+00 : f32
      %16 = vector.broadcast %cst : f32 to vector<16x8x5xf32>
      %c0_16 = arith.constant 0 : index
      %c0_17 = arith.constant 0 : index
      %c0_18 = arith.constant 0 : index
      %c0_19 = arith.constant 0 : index
      %17 = vector.load %arg8[%c0_16, %c0_17, %c0_18, %c0_19] : memref<1x16x8x5xf32, #tpu.memory_space<vmem>>, vector<1x16x8x5xf32>
      %18 = vector.shape_cast %17 : vector<1x16x8x5xf32> to vector<16x8x5xf32>
      %19 = vector.shape_cast %16 : vector<16x8x5xf32> to vector<1x16x8x5xf32>
      tpu.vector_store %arg8[%c0_16, %c0_17, %c0_18, %c0_19], %19 {strides = array<i32>} : memref<1x16x8x5xf32, #tpu.memory_space<vmem>>, vector<1x16x8x5xf32>,
    } else {
    }
    %c0 = arith.constant 0 : index
    %c0_1 = arith.constant 0 : index
    %c0_2 = arith.constant 0 : index
    %3 = vector.load %arg1[%c0, %c0_1, %c0_2] : memref<16x8x5xf32, #tpu.memory_space<vmem>>, vector<16x8x5xf32>
    %c0_3 = arith.constant 0 : index
    %c0_4 = arith.constant 0 : index
    %c0_5 = arith.constant 0 : index
    %4 = vector.load %arg2[%c0_3, %c0_4, %c0_5] : memref<16x8x5xf32, #tpu.memory_space<vmem>>, vector<16x8x5xf32>
    %5 = arith.subf %3, %4 : vector<16x8x5xf32>
    %6 = arith.mulf %5, %5 : vector<16x8x5xf32>
    %c0_6 = arith.constant 0 : index
    %c0_7 = arith.constant 0 : index
    %c0_8 = arith.constant 0 : index
    %c0_9 = arith.constant 0 : index
    %7 = vector.load %arg8[%c0_6, %c0_7, %c0_8, %c0_9] : memref<1x16x8x5xf32, #tpu.memory_space<vmem>>, vector<1x16x8x5xf32>
    %8 = vector.shape_cast %7 : vector<1x16x8x5xf32> to vector<16x8x5xf32>
    %9 = arith.addf %8, %6 : vector<16x8x5xf32>
    %c0_10 = arith.constant 0 : index
    %c0_11 = arith.constant 0 : index
    %c0_12 = arith.constant 0 : index
    %c0_13 = arith.constant 0 : index
    %10 = vector.load %arg8[%c0_10, %c0_11, %c0_12, %c0_13] : memref<1x16x8x5xf32, #tpu.memory_space<vmem>>, vector<1x16x8x5xf32>
    %11 = vector.shape_cast %10 : vector<1x16x8x5xf32> to vector<16x8x5xf32>
    %12 = vector.shape_cast %9 : vector<16x8x5xf32> to vector<1x16x8x5xf32>
    tpu.vector_store %arg8[%c0_10, %c0_11, %c0_12, %c0_13], %12 {strides = array<i32>} : memref<1x16x8x5xf32, #tpu.memory_space<vmem>>, vector<1x16x8x5xf32>,
    %c0_i32_14 = arith.constant 0 : i32
    %13 = arith.cmpi eq, %arg0, %c0_i32_14 : i32
    %14 = arith.extui %13 : i1 to i32
    %c0_i32_15 = arith.constant 0 : i32
    %15 = arith.cmpi ne, %14, %c0_i32_15 : i32
    scf.if %15 {
      %c0_16 = arith.constant 0 : index
      %c0_17 = arith.constant 0 : index
      %c0_18 = arith.constant 0 : index
      %c0_19 = arith.constant 0 : index
      %16 = vector.load %arg8[%c0_16, %c0_17, %c0_18, %c0_19] : memref<1x16x8x5xf32, #tpu.memory_space<vmem>>, vector<1x16x8x5xf32>
      %17 = vector.shape_cast %16 : vector<1x16x8x5xf32> to vector<16x8x5xf32>
      %18 = vector.shape_cast %17 : vector<16x8x5xf32> to vector<1x16x8x5xf32>
      %cst = arith.constant dense<0.000000e+00> : vector<1xf32>
      %19 = vector.multi_reduction <add>, %18, %cst [1, 2, 3] : vector<1x16x8x5xf32> to vector<1xf32>
      %20 = vector.shape_cast %19 : vector<1xf32> to vector<1x1x1x1xf32>
      %21 = vector.extract %20[0, 0, 0, 0] : f32 from vector<1x1x1x1xf32>
      %cst_20 = arith.constant 1.562500e-03 : f32
      %22 = arith.mulf %21, %cst_20 : f32
      %c0_21 = arith.constant 0 : index
      %c0_22 = arith.constant 0 : index
      %c0_23 = arith.constant 0 : index
      %23 = vector.load %arg3[%c0_21, %c0_22, %c0_23] : memref<2x8x4xf32, #tpu.memory_space<vmem>>, vector<2x8x4xf32>
      %c0_24 = arith.constant 0 : index
      %c0_25 = arith.constant 0 : index
      %c0_26 = arith.constant 0 : index
      %24 = vector.load %arg4[%c0_24, %c0_25, %c0_26] : memref<2x8x4xf32, #tpu.memory_space<vmem>>, vector<2x8x4xf32>
      %25 = arith.subf %23, %24 : vector<2x8x4xf32>
      %26 = arith.mulf %25, %25 : vector<2x8x4xf32>
      %27 = vector.shape_cast %26 : vector<2x8x4xf32> to vector<1x2x8x4xf32>
      %cst_27 = arith.constant dense<0.000000e+00> : vector<1xf32>
      %28 = vector.multi_reduction <add>, %27, %cst_27 [1, 2, 3] : vector<1x2x8x4xf32> to vector<1xf32>
      %29 = vector.shape_cast %28 : vector<1xf32> to vector<1x1x1x1xf32>
      %30 = vector.extract %29[0, 0, 0, 0] : f32 from vector<1x1x1x1xf32>
      %cst_28 = arith.constant 1.562500e-02 : f32
      %31 = arith.mulf %30, %cst_28 : f32
      %cst_29 = arith.constant 0.000000e+00 : f32
      %32 = arith.addf %cst_29, %31 : f32
      %c0_30 = arith.constant 0 : index
      %c0_31 = arith.constant 0 : index
      %33 = vector.load %arg5[%c0_30, %c0_31] : memref<2x3xf32, #tpu.memory_space<vmem>>, vector<2x3xf32>
      %c0_32 = arith.constant 0 : index
      %c0_33 = arith.constant 0 : index
      %34 = vector.load %arg6[%c0_32, %c0_33] : memref<2x3xf32, #tpu.memory_space<vmem>>, vector<2x3xf32>
      %35 = arith.subf %33, %34 : vector<2x3xf32>
      %36 = arith.mulf %35, %35 : vector<2x3xf32>
      %37 = vector.shape_cast %36 : vector<2x3xf32> to vector<1x2x3xf32>
      %cst_34 = arith.constant dense<0.000000e+00> : vector<1xf32>
      %38 = vector.multi_reduction <add>, %37, %cst_34 [1, 2] : vector<1x2x3xf32> to vector<1xf32>
      %39 = vector.shape_cast %38 : vector<1xf32> to vector<1x1x1xf32>
      %40 = vector.extract %39[0, 0, 0] : f32 from vector<1x1x1xf32>
      %cst_35 = arith.constant 0.166666672 : f32
      %41 = arith.mulf %40, %cst_35 : f32
      %42 = arith.addf %32, %41 : f32
      %43 = arith.addf %22, %42 : f32
      %44 = vector.broadcast %43 : f32 to vector<1x8x128xf32>
      %c0_36 = arith.constant 0 : index
      %c0_37 = arith.constant 0 : index
      %c0_38 = arith.constant 0 : index
      %45 = vector.load %arg7[%c0_36, %c0_37, %c0_38] : memref<1x8x128xf32, #tpu.memory_space<vmem>>, vector<1x8x128xf32>
      tpu.vector_store %arg7[%c0_36, %c0_37, %c0_38], %44 {strides = array<i32>} : memref<1x8x128xf32, #tpu.memory_space<vmem>>, vector<1x8x128xf32>,
    } else {
    }
    return
  }
  func.func @transform_0(%arg0: i32) -> (i32, i32, i32) {
    %c0_i32 = arith.constant 0 : i32
    %c0_i32_0 = arith.constant 0 : i32
    %c0_i32_1 = arith.constant 0 : i32
    return %arg0, %c0_i32, %c0_i32_0 : i32, i32, i32
  }
  func.func @transform_1(%arg0: i32) -> (i32, i32, i32) {
    %c0_i32 = arith.constant 0 : i32
    %c0_i32_0 = arith.constant 0 : i32
    %c0_i32_1 = arith.constant 0 : i32
    return %arg0, %c0_i32, %c0_i32_0 : i32, i32, i32
  }
  func.func @transform_2(%arg0: i32) -> (i32, i32, i32) {
    %c0_i32 = arith.constant 0 : i32
    %c0_i32_0 = arith.constant 0 : i32
    %c0_i32_1 = arith.constant 0 : i32
    %c0_i32_2 = arith.constant 0 : i32
    return %c0_i32, %c0_i32_0, %c0_i32_1 : i32, i32, i32
  }
  func.func @transform_3(%arg0: i32) -> (i32, i32, i32) {
    %c0_i32 = arith.constant 0 : i32
    %c0_i32_0 = arith.constant 0 : i32
    %c0_i32_1 = arith.constant 0 : i32
    %c0_i32_2 = arith.constant 0 : i32
    return %c0_i32, %c0_i32_0, %c0_i32_1 : i32, i32, i32
  }
  func.func @transform_4(%arg0: i32) -> (i32, i32) {
    %c0_i32 = arith.constant 0 : i32
    %c0_i32_0 = arith.constant 0 : i32
    %c0_i32_1 = arith.constant 0 : i32
    return %c0_i32, %c0_i32_0 : i32, i32
  }
  func.func @transform_5(%arg0: i32) -> (i32, i32) {
    %c0_i32 = arith.constant 0 : i32
    %c0_i32_0 = arith.constant 0 : i32
    %c0_i32_1 = arith.constant 0 : i32
    return %c0_i32, %c0_i32_0 : i32, i32
  }
  func.func @transform_6(%arg0: i32) -> (i32, i32, i32) {
    %c0_i32 = arith.constant 0 : i32
    %c0_i32_0 = arith.constant 0 : i32
    %c0_i32_1 = arith.constant 0 : i32
    %c0_i32_2 = arith.constant 0 : i32
    return %c0_i32, %c0_i32_0, %c0_i32_1 : i32, i32, i32
  }
}

</mosaic_0001>

<bundles_post_ra>
// kernel: train_loss.1
= control target key start
LH: loop header
LB: loop body
LE: loop exit
PB: predicated region body
PF: predicated region fallthrough
CT: control target
= control target key end

     0   :  { %vm27_vm0 = vcmask 39936   ;;  %v271_v2 = vmov 0.0   ;;  %vm244_vm1 = vcmask 17408   ;;  %vm225_vm2 = vcmask 31744   ;;  %s472_s4 = inlined_call_operand.vmem [shape: f32[2,3], index: 4, kind: input, shape index: {}]   ;;  %s473_s5 = inlined_call_operand.vmem [shape: f32[2,3], index: 5, kind: input, shape index: {}]   ;;  %s474_s0 = inlined_call_operand.vmem [shape: f32[16,8,5], index: 0, kind: input, shape index: {}]   ;;  %s475_s1 = inlined_call_operand.vmem [shape: f32[16,8,5], index: 1, kind: input, shape index: {}]   ;;  %s476_s2 = inlined_call_operand.vmem [shape: f32[2,8,4], index: 2, kind: input, shape index: {}]   ;;  %s477_s3 = inlined_call_operand.vmem [shape: f32[2,8,4], index: 3, kind: input, shape index: {}]   ;;  %s478_s6 = inlined_call_operand.vmem [shape: f32[1,8,128], index: 6, kind: output, shape index: {}]  }
   0x1   :  { %v240_v0 = vld [vmem:[%s472_s4] sm:$0x3]  ;;  %28 = vst.msk [vmem:[#allocation2] sm:$0xff] %vm27_vm0, %v271_v2  ;;  %29 = vst.msk [vmem:[#allocation2 + $0x8] sm:$0xff] %vm27_vm0, %v271_v2  ;;  %v45_v5 = vld [vmem:[%s474_s0 + $0x8] sm:$0xff] }
   0x2   :  { %v241_v1 = vld [vmem:[%s473_s5] sm:$0x3]  ;;  %30 = vst.msk [vmem:[#allocation2 + $0x10] sm:$0xff] %vm27_vm0, %v271_v2  ;;  %31 = vst.msk [vmem:[#allocation2 + $0x18] sm:$0xff] %vm27_vm0, %v271_v2  ;;  %v46_v6 = vld [vmem:[%s474_s0 + $0x10] sm:$0xff] }
   0x3   :  { %32 = vst.msk [vmem:[#allocation2 + $0x20] sm:$0xff] %vm27_vm0, %v271_v2  ;;  %33 = vst.msk [vmem:[#allocation2 + $0x28] sm:$0xff] %vm27_vm0, %v271_v2  ;;  %v242_v3 = vsub.f32 %v240_v0, %v241_v1  ;;  %v44_v4 = vld [vmem:[%s474_s0] sm:$0xff]  ;;  %v47_v8 = vld [vmem:[%s474_s0 + $0x18] sm:$0xff] }
   0x4   :  { %34 = vst.msk [vmem:[#allocation2 + $0x30] sm:$0xff] %vm27_vm0, %v271_v2  ;;  %35 = vst.msk [vmem:[#allocation2 + $0x38] sm:$0xff] %vm27_vm0, %v271_v2  ;;  %v48_v9 = vld [vmem:[%s474_s0 + $0x20] sm:$0xff]  ;;  %v49_v10 = vld [vmem:[%s474_s0 + $0x28] sm:$0xff] }
   0x5   :  { %36 = vst.msk [vmem:[#allocation2 + $0x40] sm:$0xff] %vm27_vm0, %v271_v2  ;;  %37 = vst.msk [vmem:[#allocation2 + $0x48] sm:$0xff] %vm27_vm0, %v271_v2  ;;  %v243_v7 = vmul.f32 %v242_v3, %v242_v3  ;;  %v50_v11 = vld [vmem:[%s474_s0 + $0x30] sm:$0xff]  ;;  %v51_v12 = vld [vmem:[%s474_s0 + $0x38] sm:$0xff] }
   0x6   :  { %38 = vst.msk [vmem:[#allocation2 + $0x50] sm:$0xff] %vm27_vm0, %v271_v2  ;;  %39 = vst.msk [vmem:[#allocation2 + $0x58] sm:$0xff] %vm27_vm0, %v271_v2  ;;  %v52_v13 = vld [vmem:[%s474_s0 + $0x40] sm:$0xff]  ;;  %v53_v15 = vld [vmem:[%s474_s0 + $0x48] sm:$0xff] }
   0x7   :  { %40 = vst.msk [vmem:[#allocation2 + $0x60] sm:$0xff] %vm27_vm0, %v271_v2  ;;  %41 = vst.msk [vmem:[#allocation2 + $0x68] sm:$0xff] %vm27_vm0, %v271_v2  ;;  %v245_v14 = vsel %vm244_vm1, %v243_v7, 0.0  ;;  %v54_v16 = vld [vmem:[%s474_s0 + $0x50] sm:$0xff]  ;;  %v55_v17 = vld [vmem:[%s474_s0 + $0x58] sm:$0xff] }
   0x8   :  { %42 = vst.msk [vmem:[#allocation2 + $0x70] sm:$0xff] %vm27_vm0, %v271_v2  ;;  %43 = vst.msk [vmem:[#allocation2 + $0x78] sm:$0xff] %vm27_vm0, %v271_v2  ;;  %246 = vadd.xlane.f32.xlu1 %v245_v14  ;;  %v56_v18 = vld [vmem:[%s474_s0 + $0x60] sm:$0xff]  ;;  %v57_v19 = vld [vmem:[%s474_s0 + $0x68] sm:$0xff] }
   0x9   :  { %v58_v20 = vld [vmem:[%s474_s0 + $0x70] sm:$0xff]  ;;  %v60_v21 = vld [vmem:[%s475_s1] sm:$0xff]  ;;  %v61_v22 = vld [vmem:[%s475_s1 + $0x8] sm:$0xff] }
   0xa   :  { %v62_v23 = vld [vmem:[%s475_s1 + $0x10] sm:$0xff]  ;;  %v59_v24 = vld [vmem:[%s474_s0 + $0x78] sm:$0xff]  ;;  %v64_v26 = vld [vmem:[%s475_s1 + $0x20] sm:$0xff]  ;;  %v76_v28 = vsub.f32 %v44_v4, %v60_v21  ;;  %v77_v29 = vsub.f32 %v45_v5, %v61_v22 }
   0xb   :  { %v63_v25 = vld [vmem:[%s475_s1 + $0x18] sm:$0xff]  ;;  %v65_v27 = vld [vmem:[%s475_s1 + $0x28] sm:$0xff]  ;;  %v78_v30 = vsub.f32 %v46_v6, %v62_v23  ;;  %v66_v31 = vld [vmem:[%s475_s1 + $0x30] sm:$0xff]  ;;  %v80_v35 = vsub.f32 %v48_v9, %v64_v26 }
   0xc   :  { %v67_v32 = vld [vmem:[%s475_s1 + $0x38] sm:$0xff]  ;;  %v68_v33 = vld [vmem:[%s475_s1 + $0x40] sm:$0xff]  ;;  %v79_v34 = vsub.f32 %v47_v8, %v63_v25  ;;  %v81_v36 = vsub.f32 %v49_v10, %v65_v27  ;;  %v69_v37 = vld [vmem:[%s475_s1 + $0x48] sm:$0xff]  ;;  %v82_v40 = vsub.f32 %v50_v11, %v66_v31  ;;  %v92_v43 = vmul.f32 %v76_v28, %v76_v28 }
   0xd   :  { %v70_v38 = vld [vmem:[%s475_s1 + $0x50] sm:$0xff]  ;;  %v71_v39 = vld [vmem:[%s475_s1 + $0x58] sm:$0xff]  ;;  %v83_v41 = vsub.f32 %v51_v12, %v67_v32  ;;  %v84_v42 = vsub.f32 %v52_v13, %v68_v33  ;;  %v72_v44 = vld [vmem:[%s475_s1 + $0x60] sm:$0xff]  ;;  %v85_v47 = vsub.f32 %v53_v15, %v69_v37  ;;  %v93_v50 = vmul.f32 %v77_v29, %v77_v29 }
   0xe   :  { %v73_v45 = vld [vmem:[%s475_s1 + $0x68] sm:$0xff]  ;;  %v74_v46 = vld [vmem:[%s475_s1 + $0x70] sm:$0xff]  ;;  %v86_v48 = vsub.f32 %v54_v16, %v70_v38  ;;  %v87_v49 = vsub.f32 %v55_v17, %v71_v39  ;;  %v75_v51 = vld [vmem:[%s475_s1 + $0x78] sm:$0xff]  ;;  %v88_v52 = vsub.f32 %v56_v18, %v72_v44  ;;  %v94_v55 = vmul.f32 %v78_v30, %v78_v30 }
   0xf   :  { %v89_v53 = vsub.f32 %v57_v19, %v73_v45  ;;  %v90_v54 = vsub.f32 %v58_v20, %v74_v46  ;;  %v108_v56 = vld [vmem:[#allocation2] sm:$0xff]  ;;  %v109_v57 = vld [vmem:[#allocation2 + $0x8] sm:$0xff]  ;;  %v91_v58 = vsub.f32 %v59_v24, %v75_v51  ;;  %v95_v59 = vmul.f32 %v79_v34, %v79_v34  ;;  %v110_v62 = vld [vmem:[#allocation2 + $0x10] sm:$0xff] }
  0x10   :  { %v96_v60 = vmul.f32 %v80_v35, %v80_v35  ;;  %v97_v61 = vmul.f32 %v81_v36, %v81_v36  ;;  %v111_v63 = vld [vmem:[#allocation2 + $0x18] sm:$0xff]  ;;  %v112_v0 = vld [vmem:[#allocation2 + $0x20] sm:$0xff]  ;;  %v98_v1 = vmul.f32 %v82_v40, %v82_v40  ;;  %v99_v2 = vmul.f32 %v83_v41, %v83_v41  ;;  %v113_v5 = vld [vmem:[#allocation2 + $0x28] sm:$0xff] }
  0x11   :  { %v100_v3 = vmul.f32 %v84_v42, %v84_v42  ;;  %v101_v4 = vmul.f32 %v85_v47, %v85_v47  ;;  %v114_v6 = vld [vmem:[#allocation2 + $0x30] sm:$0xff]  ;;  %v115_v7 = vld [vmem:[#allocation2 + $0x38] sm:$0xff]  ;;  %v102_v8 = vmul.f32 %v86_v48, %v86_v48  ;;  %v103_v9 = vmul.f32 %v87_v49, %v87_v49  ;;  %v116_v12 = vld [vmem:[#allocation2 + $0x40] sm:$0xff] }
  0x12   :  { %v104_v10 = vmul.f32 %v88_v52, %v88_v52  ;;  %v105_v11 = vmul.f32 %v89_v53, %v89_v53  ;;  %v117_v13 = vld [vmem:[#allocation2 + $0x48] sm:$0xff]  ;;  %v118_v14 = vld [vmem:[#allocation2 + $0x50] sm:$0xff]  ;;  %v106_v15 = vmul.f32 %v90_v54, %v90_v54  ;;  %v107_v16 = vmul.f32 %v91_v58, %v91_v58  ;;  %v119_v17 = vld [vmem:[#allocation2 + $0x58] sm:$0xff] }
  0x13   :  { %v120_v18 = vld [vmem:[#allocation2 + $0x60] sm:$0xff]  ;;  %v121_v19 = vld [vmem:[#allocation2 + $0x68] sm:$0xff]  ;;  %v124_v20 = vadd.f32 %v108_v56, %v92_v43  ;;  %v125_v21 = vadd.f32 %v109_v57, %v93_v50  ;;  %v122_v22 = vld [vmem:[#allocation2 + $0x70] sm:$0xff]  ;;  %v126_v24 = vadd.f32 %v110_v62, %v94_v55  ;;  %v127_v25 = vadd.f32 %v111_v63, %v95_v59 }
  0x14   :  { %v123_v23 = vld [vmem:[#allocation2 + $0x78] sm:$0xff]  ;;  %v128_v26 = vadd.f32 %v112_v0, %v96_v60  ;;  %v129_v27 = vadd.f32 %v113_v5, %v97_v61  ;;  %v130_v28 = vadd.f32 %v114_v6, %v98_v1  ;;  %v131_v29 = vadd.f32 %v115_v7, %v99_v2  ;;  %v217_v5 = vld [vmem:[%s476_s2] sm:$0xff]  ;;  %v218_v6 = vld [vmem:[%s476_s2 + $0x8] sm:$0xff] }
  0x15   :  { %v132_v30 = vadd.f32 %v116_v12, %v100_v3  ;;  %v133_v31 = vadd.f32 %v117_v13, %v101_v4  ;;  %141 = vst.msk [vmem:[#allocation2] sm:$0xff] %vm27_vm0, %v124_v20  ;;  %142 = vst.msk [vmem:[#allocation2 + $0x8] sm:$0xff] %vm27_vm0, %v125_v21  ;;  %v134_v32 = vadd.f32 %v118_v14, %v102_v8 }
  0x16   :  { %v135_v33 = vadd.f32 %v119_v17, %v103_v9  ;;  %v136_v34 = vadd.f32 %v120_v18, %v104_v10  ;;  %v137_v35 = vadd.f32 %v121_v19, %v105_v11  ;;  %143 = vst.msk [vmem:[#allocation2 + $0x10] sm:$0xff] %vm27_vm0, %v126_v24  ;;  %144 = vst.msk [vmem:[#allocation2 + $0x18] sm:$0xff] %vm27_vm0, %v127_v25  ;;  %v219_v9 = vld [vmem:[%s477_s3] sm:$0xff]  ;;  %v220_v10 = vld [vmem:[%s477_s3 + $0x8] sm:$0xff] }
  0x17   :  { %145 = vst.msk [vmem:[#allocation2 + $0x20] sm:$0xff] %vm27_vm0, %v128_v26  ;;  %146 = vst.msk [vmem:[#allocation2 + $0x28] sm:$0xff] %vm27_vm0, %v129_v27  ;;  %v138_v36 = vadd.f32 %v122_v22, %v106_v15  ;;  %v139_v37 = vadd.f32 %v123_v23, %v107_v16  ;;  %v221_v15 = vsub.f32 %v217_v5, %v219_v9 }
  0x18   :  { %147 = vst.msk [vmem:[#allocation2 + $0x30] sm:$0xff] %vm27_vm0, %v130_v28  ;;  %148 = vst.msk [vmem:[#allocation2 + $0x38] sm:$0xff] %vm27_vm0, %v131_v29  ;;  %v222_v16 = vsub.f32 %v218_v6, %v220_v10 }
  0x19   :  { %149 = vst.msk [vmem:[#allocation2 + $0x40] sm:$0xff] %vm27_vm0, %v132_v30  ;;  %150 = vst.msk [vmem:[#allocation2 + $0x48] sm:$0xff] %vm27_vm0, %v133_v31  ;;  %v223_v23 = vmul.f32 %v221_v15, %v221_v15 }
  0x1a   :  { %151 = vst.msk [vmem:[#allocation2 + $0x50] sm:$0xff] %vm27_vm0, %v134_v32  ;;  %152 = vst.msk [vmem:[#allocation2 + $0x58] sm:$0xff] %vm27_vm0, %v135_v33  ;;  %v224_v24 = vmul.f32 %v222_v16, %v222_v16 }
  0x1b   :  { %153 = vst.msk [vmem:[#allocation2 + $0x60] sm:$0xff] %vm27_vm0, %v136_v34  ;;  %154 = vst.msk [vmem:[#allocation2 + $0x68] sm:$0xff] %vm27_vm0, %v137_v35  ;;  %v226_v28 = vsel %vm225_vm2, %v223_v23, 0.0 }
  0x1c   :  { %155 = vst.msk [vmem:[#allocation2 + $0x70] sm:$0xff] %vm27_vm0, %v138_v36  ;;  %156 = vst.msk [vmem:[#allocation2 + $0x78] sm:$0xff] %vm27_vm0, %v139_v37  ;;  %v160_v38 = vld [vmem:[#allocation2] sm:$0xff]  ;;  %v161_v39 = vld [vmem:[#allocation2 + $0x8] sm:$0xff]  ;;  %v227_v29 = vsel %vm225_vm2, %v224_v24, 0.0 }
  0x1d   :  { %v162_v40 = vld [vmem:[#allocation2 + $0x10] sm:$0xff]  ;;  %v163_v41 = vld [vmem:[#allocation2 + $0x18] sm:$0xff]  ;;  %v176_v42 = vsel %vm27_vm0, %v160_v38, 0.0  ;;  %v177_v43 = vsel %vm27_vm0, %v161_v39, 0.0  ;;  %v228_v31 = vadd.f32 %v227_v29, %v226_v28 }
  0x1e   :  { %v164_v44 = vld [vmem:[#allocation2 + $0x20] sm:$0xff]  ;;  %v178_v45 = vadd.f32 %v177_v43, %v176_v42  ;;  %v179_v46 = vsel %vm27_vm0, %v162_v40, 0.0  ;;  %v181_v47 = vsel %vm27_vm0, %v163_v41, 0.0  ;;  %v165_v48 = vld [vmem:[#allocation2 + $0x28] sm:$0xff] }
  0x1f   :  { %v183_v50 = vsel %vm27_vm0, %v164_v44, 0.0  ;;  %v166_v51 = vld [vmem:[#allocation2 + $0x30] sm:$0xff]  ;;  %v185_v53 = vsel %vm27_vm0, %v165_v48, 0.0  ;;  %v167_v54 = vld [vmem:[#allocation2 + $0x38] sm:$0xff] }
  0x20   :  { %v180_v49 = vadd.f32 %v179_v46, %v178_v45  ;;  %v187_v56 = vsel %vm27_vm0, %v166_v51, 0.0  ;;  %v168_v57 = vld [vmem:[#allocation2 + $0x40] sm:$0xff]  ;;  %v189_v59 = vsel %vm27_vm0, %v167_v54, 0.0  ;;  %v169_v60 = vld [vmem:[#allocation2 + $0x48] sm:$0xff] }
  0x21   :  { %v191_v62 = vsel %vm27_vm0, %v168_v57, 0.0  ;;  %v170_v63 = vld [vmem:[#allocation2 + $0x50] sm:$0xff]  ;;  %v193_v1 = vsel %vm27_vm0, %v169_v60, 0.0  ;;  %v171_v2 = vld [vmem:[#allocation2 + $0x58] sm:$0xff] }
  0x22   :  { %v182_v52 = vadd.f32 %v181_v47, %v180_v49  ;;  %v195_v4 = vsel %vm27_vm0, %v170_v63, 0.0  ;;  %v172_v7 = vld [vmem:[#allocation2 + $0x60] sm:$0xff]  ;;  %v197_v11 = vsel %vm27_vm0, %v171_v2, 0.0  ;;  %v173_v12 = vld [vmem:[#allocation2 + $0x68] sm:$0xff] }
  0x23   :  { %v199_v14 = vsel %vm27_vm0, %v172_v7, 0.0  ;;  %v174_v17 = vld [vmem:[#allocation2 + $0x70] sm:$0xff]  ;;  %v201_v19 = vsel %vm27_vm0, %v173_v12, 0.0  ;;  %v175_v20 = vld [vmem:[#allocation2 + $0x78] sm:$0xff] }
  0x24   :  { %v184_v55 = vadd.f32 %v183_v50, %v182_v52  ;;  %v203_v22 = vsel %vm27_vm0, %v174_v17, 0.0  ;;  %v205_v26 = vsel %vm27_vm0, %v175_v20, 0.0 }
  0x26   :  { %v186_v58 = vadd.f32 %v185_v53, %v184_v55 }
  0x28   :  { %v188_v61 = vadd.f32 %v187_v56, %v186_v58 }
  0x2a   :  { %v190_v0 = vadd.f32 %v189_v59, %v188_v61 }
  0x2c   :  { %v192_v3 = vadd.f32 %v191_v62, %v190_v0 }
  0x2e   :  { %v194_v8 = vadd.f32 %v193_v1, %v192_v3 }
  0x30   :  { %v196_v13 = vadd.f32 %v195_v4, %v194_v8 }
  0x32   :  { %v198_v18 = vadd.f32 %v197_v11, %v196_v13 }
  0x34   :  { %v200_v21 = vadd.f32 %v199_v14, %v198_v18 }
  0x36   :  { %v202_v25 = vadd.f32 %v201_v19, %v200_v21 }
  0x38   :  { %v204_v27 = vadd.f32 %v203_v22, %v202_v25 }
  0x3a   :  { %v206_v30 = vadd.f32 %v205_v26, %v204_v27 }
  0x3c   :  { %207 = vadd.xlane.f32.xlu0 %v206_v30 }
  0x40   :  { %229 = vadd.xlane.f32.xlu0 %v228_v31 }
  0x95   :  { %v247_v32 = vpop.xlane.xlu1 %246 }
  0x96   :  { %v248_v33 = vrot.slane %v247_v32, 4 }
  0x98   :  { %v249_v34 = vadd.f32 %v248_v33, %v247_v32 }
  0x9a   :  { %v250_v38 = vrot.slane %v249_v34, 2 }
  0x9c   :  { %v251_v44 = vadd.f32 %v250_v38, %v249_v34 }
  0x9e   :  { %v252_v49 = vrot.slane %v251_v44, 1 }
  0xa0   :  { %v253_v52 = vadd.f32 %v252_v49, %v251_v44 }
  0xc9   :  { %v208_v35 = vpop.xlane.xlu0 %207 }
  0xca   :  { %v209_v36 = vrot.slane %v208_v35, 4 }
  0xcc   :  { %v210_v37 = vadd.f32 %v209_v36, %v208_v35 }
  0xcd   :  { %v230_v39 = vpop.xlane.xlu0 %229 }
  0xce   :  { %v211_v40 = vrot.slane %v210_v37, 2  ;;  %v231_v41 = vrot.slane %v230_v39, 4 }
  0xd0   :  { %v232_v42 = vadd.f32 %v231_v41, %v230_v39  ;;  %v212_v43 = vadd.f32 %v211_v40, %v210_v37 }
  0xd2   :  { %v233_v45 = vrot.slane %v232_v42, 2  ;;  %v213_v46 = vrot.slane %v212_v43, 1 }
  0xd4   :  { %v234_v47 = vadd.f32 %v233_v45, %v232_v42  ;;  %v214_v48 = vadd.f32 %v213_v46, %v212_v43 }
  0xd6   :  { %264 = vpush %v214_v48  ;;  %v235_v50 = vrot.slane %v234_v47, 1 }
  0xd8   :  { %v236_v51 = vadd.f32 %v235_v50, %v234_v47 }
  0xda   :  { %266 = vpush %v236_v51 }
  0xdb   :  { %268 = vpush %v253_v52 }
 0x107   :  { %s265_s2 = spop %264 }
 0x108   :  { %s216_s19 = smul.f32 0.0015625, %s265_s2 }
 0x10b   :  { %s267_s3 = spop %266 }
 0x10c   :  { %s238_s17 = smul.f32 0.015625, %s267_s3  ;;  %s269_s18 = spop %268 }
 0x10d   :  { %s255_s0 = smul.f32 0.16666667, %s269_s18 }
 0x10f   :  { %s256_s20 = sadd.f32 %s255_s0, %s238_s17 }
 0x111   :  { %s257_s21 = sadd.f32 %s256_s20, %s216_s19 }
 0x113   :  { %v258_v53 = vstv %s257_s21 }
 0x114   :  { %259 = vst [vmem:[%s478_s6] sm:$0xff] %v258_v53 }

</bundles_post_ra>
